<compile_context>
chip_gen: v6e
topology: v6e:2x2x1
jax: 0.10.0
libtpu: 0.0.40
codegen_flags: <defaults>
</compile_context>

<pallas_src>
import jax
import jax.numpy as jnp
from jax.experimental import pallas as pl
from jax.experimental.pallas import tpu as pltpu


def _copy_kernel(x_ref, o_ref):
    # Whole-tile elementwise copy (identity).
    o_ref[...] = x_ref[...]


# Candidate lane-dense widths (large multiples of 128), biggest first.
_LANE_WIDTHS = (4096, 2048, 1024, 512, 256, 128)
# Per-tile byte budget: 4 MiB tile -> <=16 MiB double-buffered (in + out),
# which fits v5e's 16 MiB / v6e-v7x's 32 MiB scoped VMEM defaults.
_TILE_BYTES = 4 * 1024 * 1024


def identity_jrnmm(x, n_extra=0):
    """Pallas equivalent of IdentityJRNMM.forward: returns x unchanged.

    `n_extra` is accepted for API parity with the PyTorch module but, as in the
    reference, has no effect on the output.
    """
    del n_extra  # unused, same as the reference forward
    orig_shape = x.shape
    n = x.size
    if n == 0:
        return x

    # Flatten to a lane-dense 2D slab: last dim is the largest width in
    # _LANE_WIDTHS that divides N; otherwise a single (1, N) full block.
    cols = next((c for c in _LANE_WIDTHS if n % c == 0), n)
    rows = n // cols
    x2 = x.reshape(rows, cols)

    # Largest row tile within the VMEM budget that divides `rows` evenly and is a
    # multiple of 8 sublanes (or the full extent, which is exempt from (8,128)).
    bytes_per_row = max(1, cols * x.dtype.itemsize)
    max_rows = max(1, _TILE_BYTES // bytes_per_row)
    tile_rows = rows
    if rows > max_rows:
        cand = (max_rows // 8) * 8
        while cand >= 8 and rows % cand != 0:
            cand -= 8
        if cand >= 8:
            tile_rows = cand
        # else: fall back to full extent (only hit for awkward row counts).

    grid = (rows // tile_rows,)

    y2 = pl.pallas_call(
        _copy_kernel,
        out_shape=jax.ShapeDtypeStruct((rows, cols), x.dtype),
        grid=grid,
        in_specs=[pl.BlockSpec((tile_rows, cols), lambda i: (i, 0))],
        out_specs=pl.BlockSpec((tile_rows, cols), lambda i: (i, 0)),
        # Identity: let the output reuse the input HBM buffer when donatable.
        input_output_aliases={0: 0},
        compiler_params=pltpu.CompilerParams(
            dimension_semantics=("parallel",),
            vmem_limit_bytes=32 * 1024 * 1024,
        ),
    )(x2)

    return y2.reshape(orig_shape)


if __name__ == "__main__":
    key = jax.random.PRNGKey(0)
    # Small NCHW-style input consistent with the module's generic forward.
    x = jax.random.normal(key, (2, 4, 16, 16), dtype=jnp.float32)

    # jit so the aliased input buffer is an internal intermediate (clean donation).
    identity_fn = jax.jit(identity_jrnmm, static_argnames=("n_extra",))

    y = identity_fn(x, n_extra=0)
    y = jax.block_until_ready(y)

    assert y.shape == x.shape and y.dtype == x.dtype
    assert bool(jnp.all(y == x))
    print("KERNEL_OK")
</pallas_src>

<mosaic_0001>
module attributes {stable_mosaic.version = 11 : i64} {
  func.func @_copy_kernel(%arg0: i32, %arg1: memref<1x2048xf32, #tpu.memory_space<vmem>>, %arg2: memref<1x2048xf32, #tpu.memory_space<vmem>>) attributes {dimension_semantics = [#tpu.dimension_semantics<parallel>], iteration_bounds = array<i64: 1>, scalar_prefetch = 0 : i64, scratch_operands = 0 : i64, tpu.core_type = #tpu.core_type<tc>, window_params = [{transform_indices = @transform_0, window_bounds = array<i64: 1, 2048>}, {transform_indices = @transform_1, window_bounds = array<i64: 1, 2048>}]} {
    %c0 = arith.constant 0 : index
    %c0_0 = arith.constant 0 : index
    %0 = vector.load %arg1[%c0, %c0_0] : memref<1x2048xf32, #tpu.memory_space<vmem>>, vector<1x2048xf32>
    %c0_1 = arith.constant 0 : index
    %c0_2 = arith.constant 0 : index
    %1 = vector.load %arg2[%c0_1, %c0_2] : memref<1x2048xf32, #tpu.memory_space<vmem>>, vector<1x2048xf32>
    tpu.vector_store %arg2[%c0_1, %c0_2], %0 {strides = array<i32>} : memref<1x2048xf32, #tpu.memory_space<vmem>>, vector<1x2048xf32>,
    return
  }
  func.func @transform_0(%arg0: i32) -> (i32, i32) {
    %c0_i32 = arith.constant 0 : i32
    %c0_i32_0 = arith.constant 0 : i32
    return %arg0, %c0_i32 : i32, i32
  }
  func.func @transform_1(%arg0: i32) -> (i32, i32) {
    %c0_i32 = arith.constant 0 : i32
    %c0_i32_0 = arith.constant 0 : i32
    return %arg0, %c0_i32 : i32, i32
  }
}

</mosaic_0001>

<bundles_post_ra>
// kernel: identity_jrnmm.1
= control target key start
LH: loop header
LB: loop body
LE: loop exit
PB: predicated region body
PF: predicated region fallthrough
CT: control target
= control target key end

     0   :  { %s38_s0 = inlined_call_operand.vmem [shape: f32[1,2048], index: 0, kind: input, shape index: {}, may-alias: {0,1}]   ;;  %s39_s1 = inlined_call_operand.vmem [shape: f32[1,2048], index: 1, kind: output, shape index: {}, may-alias: {0,1}]  }
   0x1   :  { %v8_v0 = vld [vmem:[%s38_s0] sm:$0xff]  ;;  %v9_v1 = vld [vmem:[%s38_s0 + $0x8] sm:$0xff] }
   0x2   :  { %10 = vst [vmem:[%s39_s1] sm:$0xff] %v8_v0  ;;  %11 = vst [vmem:[%s39_s1 + $0x8] sm:$0xff] %v9_v1 }

</bundles_post_ra>
